<compile_context>
chip_gen: v5e
topology: v5e:2x2
jax: 0.10.0
libtpu: 0.0.40
codegen_flags: <defaults>
</compile_context>

<pallas_src>
import functools

import jax
import jax.numpy as jnp
from jax.experimental import pallas as pl
from jax.experimental.pallas import tpu as pltpu

LN_EPS = 1e-5  # torch nn.LayerNorm default


# ---------------------------------------------------------------------------
# In-kernel math helpers
# ---------------------------------------------------------------------------
def _gelu(x):
    # tanh-approximation GELU: the tanh goes to the EUP slot (nearly free vs.
    # the VALU-bound A&S erf).  Max abs deviation from torch's exact-erf
    # nn.GELU is ~3e-4 — fine for an f32 forward pass.
    c = 0.7978845608028654  # sqrt(2/pi)
    return 0.5 * x * (1.0 + jnp.tanh(c * (x + 0.044715 * x * x * x)))


def _layernorm(x, w, b):
    mu = jnp.mean(x, axis=-1, keepdims=True)
    var = jnp.mean(jnp.square(x - mu), axis=-1, keepdims=True)
    return (x - mu) * jax.lax.rsqrt(var + LN_EPS) * w + b


# ---------------------------------------------------------------------------
# Kernel 1: the whole mixer stack.  grid = (depth,), x/y resident in VMEM.
# ---------------------------------------------------------------------------
def _mixer_stack_kernel(x0_ref, convw_ref, convb_ref, lnv_ref,
                        ffw1_ref, ffb1_ref, ffw2_ref,
                        s_ref, x_sc, y_sc, *, batch, length):
    """One MixerBlock layer (both branches) per grid step.

    x0_ref   : (B*T, D) f32   embedded tokens (resident, same block every step)
    convw_ref: (2, T, T) bf16 masked conv weights [forward, reverse] for layer l
    convb_ref: (2, T, 1) f32  conv biases
    lnv_ref  : (8, D)   f32   rows: seqf_w, seqf_b, seqr_w, seqr_b,
                              patch_w, patch_b, ff_b2, <pad>
    ffw1_ref : (D, H)  bf16 ; ffb1_ref : (1, H) f32 ; ffw2_ref : (H, D) bf16
    s_ref    : (B*T, D) f32   output = x_final + y_final (what lm_head needs)
    x_sc/y_sc: (B*T, D) f32   VMEM scratch, persists across the depth grid
    """
    layer = pl.program_id(0)

    @pl.when(layer == 0)
    def _init():
        x0 = x0_ref[...]
        x_sc[...] = x0
        y_sc[...] = x0

    lnv = lnv_ref[...]                       # (8, D) f32
    pat_w, pat_b = lnv[4:5], lnv[5:6]
    ff_b2 = lnv[6:7]
    w1 = ffw1_ref[...]                       # (D, H) bf16
    b1 = ffb1_ref[...]                       # (1, H) f32
    w2 = ffw2_ref[...]                       # (H, D) bf16

    def branch(z, seq_w, seq_b, cw, cb):
        # --- sequence (token) mixing: LN over D, masked (T,T) conv matmul, residual
        h = _layernorm(z, seq_w, seq_b)
        parts = []
        for b in range(batch):               # static unroll; tiny B
            hb = h[b * length:(b + 1) * length].astype(jnp.bfloat16)
            parts.append(
                jnp.dot(cw, hb, preferred_element_type=jnp.float32) + cb)
        z = (jnp.concatenate(parts, axis=0) if batch > 1 else parts[0]) + z
        # --- channel mixing: LN, Linear -> GELU -> Linear (shared weights), residual
        h = _layernorm(z, pat_w, pat_b)
        h = _gelu(jnp.dot(h.astype(jnp.bfloat16), w1,
                          preferred_element_type=jnp.float32) + b1)
        h = jnp.dot(h.astype(jnp.bfloat16), w2,
                    preferred_element_type=jnp.float32) + ff_b2
        return h + z

    # Two independent matmul chains (forward / reverse branch) issued
    # back-to-back so the scheduler can interleave them on the MXU.
    x_new = branch(x_sc[...], lnv[0:1], lnv[1:2], convw_ref[0], convb_ref[0])
    y_new = branch(y_sc[...], lnv[2:3], lnv[3:4], convw_ref[1], convb_ref[1])
    x_sc[...] = x_new
    y_sc[...] = y_new

    @pl.when(layer == pl.num_programs(0) - 1)
    def _finalize():
        # lm_head(x) + lm_head(y) == (x + y) @ W  (shared weight, no bias),
        # so only the branch sum ever leaves the kernel.
        s_ref[...] = x_sc[...] + y_sc[...]


# ---------------------------------------------------------------------------
# Kernel 2: fused lm_head + cross-entropy (un-gridded; whole batch in VMEM).
# ---------------------------------------------------------------------------
def _head_ce_kernel(s_ref, w_ref, lbl_ref, logits_ref, loss_ref):
    """logits = (x+y) @ W written once; CE reduced in-kernel.

    s_ref   : (B*T, D) f32,  w_ref : (D, V) bf16,
    lbl_ref : (B*T, 1) int32 shifted labels, -1 marks the (shifted-out) last
              position of each sequence.
    logits_ref : (B*T, V) f32 ; loss_ref : (1, 1) f32 (sum of token losses).
    """
    logits = jnp.dot(s_ref[...].astype(jnp.bfloat16), w_ref[...],
                     preferred_element_type=jnp.float32)          # (BT, V)
    logits_ref[...] = logits

    lbl = lbl_ref[...]                                            # (BT, 1) i32
    m = jnp.max(logits, axis=-1, keepdims=True)
    lse = m + jnp.log(jnp.sum(jnp.exp(logits - m), axis=-1, keepdims=True))
    col = jax.lax.broadcasted_iota(jnp.int32, logits.shape, 1)
    picked = jnp.sum(jnp.where(col == lbl, logits, 0.0),
                     axis=-1, keepdims=True)
    valid = (lbl >= 0).astype(jnp.float32)
    loss_ref[...] = jnp.sum(valid * (lse - picked), axis=0, keepdims=True)


# ---------------------------------------------------------------------------
# pallas_call wrappers / full forward
# ---------------------------------------------------------------------------
def mixer_stack(x0, conv_w, conv_b, ln_vecs, ff_w1, ff_b1, ff_w2, *, batch, length):
    BT, D = x0.shape
    depth = conv_w.shape[0]
    T = conv_w.shape[-1]
    H = ff_w1.shape[-1]
    return pl.pallas_call(
        functools.partial(_mixer_stack_kernel, batch=batch, length=length),
        out_shape=jax.ShapeDtypeStruct((BT, D), jnp.float32),
        grid=(depth,),
        in_specs=[
            pl.BlockSpec((BT, D), lambda l: (0, 0)),            # x0 (resident)
            pl.BlockSpec((None, 2, T, T), lambda l: (l, 0, 0, 0)),  # conv weights
            pl.BlockSpec((None, 2, T, 1), lambda l: (l, 0, 0, 0)),  # conv biases
            pl.BlockSpec((None, 8, D), lambda l: (l, 0, 0)),        # packed LN/bias vecs
            pl.BlockSpec((None, D, H), lambda l: (l, 0, 0)),        # ff w1
            pl.BlockSpec((None, 1, H), lambda l: (l, 0, 0)),        # ff b1
            pl.BlockSpec((None, H, D), lambda l: (l, 0, 0)),        # ff w2
        ],
        out_specs=pl.BlockSpec((BT, D), lambda l: (0, 0)),
        scratch_shapes=[pltpu.VMEM((BT, D), jnp.float32),
                        pltpu.VMEM((BT, D), jnp.float32)],
        compiler_params=pltpu.CompilerParams(
            dimension_semantics=("arbitrary",)),                 # sequential over depth
    )(x0, conv_w, conv_b, ln_vecs, ff_w1, ff_b1, ff_w2)


def head_and_ce(s, w_t, shift_lbl):
    BT, _ = s.shape
    V = w_t.shape[-1]
    # Single un-gridded call: whole-array blocks in VMEM (tiny at these shapes).
    # TODO(synk): at realistic dims (D>=1024, V>=32k) tile the vocab axis
    # (grid over V//128k-tiles) so the (D,V) weight fits VMEM on v7x.
    return pl.pallas_call(
        _head_ce_kernel,
        out_shape=(jax.ShapeDtypeStruct((BT, V), jnp.float32),
                   jax.ShapeDtypeStruct((1, 1), jnp.float32)),
    )(s, w_t, shift_lbl)


def init_params(key, n_vocab, dim, depth, length, expansion=4):
    hidden = dim * expansion
    keys = iter(jax.random.split(key, 2 + 6 * depth))

    def nrm(shape, scale=0.02):
        return scale * jax.random.normal(next(keys), shape, dtype=jnp.float32)

    conv_w, conv_b, ln_vecs, ff_w1, ff_b1, ff_w2 = [], [], [], [], [], []
    for _ in range(depth):
        # clm_mask=False masking of MixerBlock.forward applied once here:
        cf = jnp.tril(nrm((length, length)))           # forward branch: causal
        cr = jnp.triu(nrm((length, length)), k=2)      # reverse branch: anti-causal, offset 2
        conv_w.append(jnp.stack([cf, cr]))
        conv_b.append(jnp.stack([nrm((length, 1)), nrm((length, 1))]))
        ln_vecs.append(jnp.stack([
            jnp.ones((dim,), jnp.float32), jnp.zeros((dim,), jnp.float32),  # seq_layernormf w,b
            jnp.ones((dim,), jnp.float32), jnp.zeros((dim,), jnp.float32),  # seq_layernormr w,b
            jnp.ones((dim,), jnp.float32), jnp.zeros((dim,), jnp.float32),  # patch_layernorm w,b
            jnp.zeros((dim,), jnp.float32),                                 # ff second Linear bias
            jnp.zeros((dim,), jnp.float32),                                 # pad row (8-sublane align)
        ]))
        ff_w1.append(nrm((dim, hidden)))
        ff_b1.append(jnp.zeros((1, hidden), jnp.float32))
        ff_w2.append(nrm((hidden, dim)))

    return {
        "wte": nrm((n_vocab, dim)),                               # f32 embedding table
        # Matmul operands stored bf16 (MXU-native on v5e/v6e/v7x, halves DMA);
        # LayerNorm params, biases and accumulation stay f32.
        "lm_head_T": nrm((dim, n_vocab)).astype(jnp.bfloat16),    # Linear(dim,V,bias=False), transposed
        "conv_w": jnp.stack(conv_w).astype(jnp.bfloat16),         # (depth, 2, T, T)
        "conv_b": jnp.stack(conv_b),                              # (depth, 2, T, 1) f32
        "ln_vecs": jnp.stack(ln_vecs),                            # (depth, 8, D)   f32
        "ff_w1": jnp.stack(ff_w1).astype(jnp.bfloat16),           # (depth, D, H)
        "ff_b1": jnp.stack(ff_b1),                                # (depth, 1, H)   f32
        "ff_w2": jnp.stack(ff_w2).astype(jnp.bfloat16),           # (depth, H, D)
    }


def language_mixer_forward(params, input_ids, labels):
    B, P, T = input_ids.shape                 # module usage implies P == 1
    BT = B * P * T
    D = params["wte"].shape[-1]
    V = params["lm_head_T"].shape[-1]

    # Embedding lookup: data-dependent row gather kept in plain JAX (glue).
    ids = input_ids.reshape(BT)
    x0 = params["wte"][ids]                   # (B*T, D) f32; x and y start identical

    # Whole mixer stack (all layers, both branches) in one pallas_call;
    # returns s = x_final + y_final.
    s = mixer_stack(x0, params["conv_w"], params["conv_b"], params["ln_vecs"],
                    params["ff_w1"], params["ff_b1"], params["ff_w2"],
                    batch=B * P, length=T)

    # Shifted labels, flattened to match the (B*T, V) logits rows; -1 marks the
    # final position of each sequence (no next-token target).
    labels_flat = labels.reshape(B, P * T).astype(jnp.int32)
    shift_lbl = jnp.concatenate(
        [labels_flat[:, 1:], jnp.full((B, 1), -1, jnp.int32)],
        axis=1).reshape(BT, 1)

    logits_flat, loss_sum = head_and_ce(s, params["lm_head_T"], shift_lbl)

    logits = logits_flat.reshape(B * P, T, V)
    output = jnp.transpose(logits, (0, 2, 1))           # 'b t e -> b e t'
    loss = loss_sum[0, 0] / (B * (P * T - 1))           # CE mean over B*(T-1) tokens
    return loss, output


if __name__ == "__main__":
    # Small shapes consistent with the module: dim=32, tokenized_length=8,
    # n_vocab=256, depth=2, batch=2, patch dim p=1.
    B, P, T, D, V, DEPTH = 2, 1, 8, 32, 256, 2
    key = jax.random.PRNGKey(0)
    k_param, k_ids = jax.random.split(key)
    params = init_params(k_param, V, D, DEPTH, T)
    input_ids = jax.random.randint(k_ids, (B, P, T), 0, V, dtype=jnp.int32)
    labels = input_ids  # standard LM setup: labels == input_ids (shifted inside)

    loss, output = language_mixer_forward(params, input_ids, labels)
    jax.block_until_ready((loss, output))
    assert output.shape == (B * P, V, T)
    assert loss.shape == ()
    print("KERNEL_OK")
</pallas_src>

<mosaic_0001>
module attributes {stable_mosaic.version = 11 : i64} {
  func.func @_mixer_stack_kernel(%arg0: i32, %arg1: memref<16x32xf32, #tpu.memory_space<vmem>>, %arg2: memref<1x2x8x8xbf16, #tpu.memory_space<vmem>>, %arg3: memref<1x2x8x1xf32, #tpu.memory_space<vmem>>, %arg4: memref<1x8x32xf32, #tpu.memory_space<vmem>>, %arg5: memref<1x32x128xbf16, #tpu.memory_space<vmem>>, %arg6: memref<1x1x128xf32, #tpu.memory_space<vmem>>, %arg7: memref<1x128x32xbf16, #tpu.memory_space<vmem>>, %arg8: memref<16x32xf32, #tpu.memory_space<vmem>>, %arg9: memref<16x32xf32, #tpu.memory_space<vmem>>, %arg10: memref<16x32xf32, #tpu.memory_space<vmem>>) attributes {dimension_semantics = [#tpu.dimension_semantics<arbitrary>], iteration_bounds = array<i64: 2>, scalar_prefetch = 0 : i64, scratch_operands = 2 : i64, tpu.core_type = #tpu.core_type<tc>, window_params = [{pipeline_mode = #tpu.pipeline_mode<synchronous>, transform_indices = @transform_0, window_bounds = array<i64: 16, 32>}, {transform_indices = @transform_1, window_bounds = array<i64: 1, 2, 8, 8>}, {transform_indices = @transform_2, window_bounds = array<i64: 1, 2, 8, 1>}, {transform_indices = @transform_3, window_bounds = array<i64: 1, 8, 32>}, {transform_indices = @transform_4, window_bounds = array<i64: 1, 32, 128>}, {transform_indices = @transform_5, window_bounds = array<i64: 1, 1, 128>}, {transform_indices = @transform_6, window_bounds = array<i64: 1, 128, 32>}, {pipeline_mode = #tpu.pipeline_mode<synchronous>, transform_indices = @transform_7, window_bounds = array<i64: 16, 32>}]} {
    %c0_i32 = arith.constant 0 : i32
    %0 = arith.cmpi eq, %arg0, %c0_i32 : i32
    %1 = arith.extui %0 : i1 to i32
    %c0_i32_0 = arith.constant 0 : i32
    %2 = arith.cmpi ne, %1, %c0_i32_0 : i32
    scf.if %2 {
      %c0_71 = arith.constant 0 : index
      %c0_72 = arith.constant 0 : index
      %189 = vector.load %arg1[%c0_71, %c0_72] : memref<16x32xf32, #tpu.memory_space<vmem>>, vector<16x32xf32>
      %c0_73 = arith.constant 0 : index
      %c0_74 = arith.constant 0 : index
      %190 = vector.load %arg9[%c0_73, %c0_74] : memref<16x32xf32, #tpu.memory_space<vmem>>, vector<16x32xf32>
      tpu.vector_store %arg9[%c0_73, %c0_74], %189 {strides = array<i32>} : memref<16x32xf32, #tpu.memory_space<vmem>>, vector<16x32xf32>,
      %c0_75 = arith.constant 0 : index
      %c0_76 = arith.constant 0 : index
      %191 = vector.load %arg10[%c0_75, %c0_76] : memref<16x32xf32, #tpu.memory_space<vmem>>, vector<16x32xf32>
      tpu.vector_store %arg10[%c0_75, %c0_76], %189 {strides = array<i32>} : memref<16x32xf32, #tpu.memory_space<vmem>>, vector<16x32xf32>,
    } else {
    }
    %c0 = arith.constant 0 : index
    %c0_1 = arith.constant 0 : index
    %c0_2 = arith.constant 0 : index
    %3 = vector.load %arg4[%c0, %c0_1, %c0_2] : memref<1x8x32xf32, #tpu.memory_space<vmem>>, vector<1x8x32xf32>
    %4 = vector.shape_cast %3 : vector<1x8x32xf32> to vector<8x32xf32>
    %5 = vector.extract_strided_slice %4 {offsets = [4, 0], sizes = [1, 32], strides = [1, 1]} : vector<8x32xf32> to vector<1x32xf32>
    %6 = vector.extract_strided_slice %4 {offsets = [5, 0], sizes = [1, 32], strides = [1, 1]} : vector<8x32xf32> to vector<1x32xf32>
    %7 = vector.extract_strided_slice %4 {offsets = [6, 0], sizes = [1, 32], strides = [1, 1]} : vector<8x32xf32> to vector<1x32xf32>
    %c0_3 = arith.constant 0 : index
    %c0_4 = arith.constant 0 : index
    %c0_5 = arith.constant 0 : index
    %8 = vector.load %arg5[%c0_3, %c0_4, %c0_5] : memref<1x32x128xbf16, #tpu.memory_space<vmem>>, vector<1x32x128xbf16>
    %9 = vector.shape_cast %8 : vector<1x32x128xbf16> to vector<32x128xbf16>
    %c0_6 = arith.constant 0 : index
    %c0_7 = arith.constant 0 : index
    %c0_8 = arith.constant 0 : index
    %10 = vector.load %arg6[%c0_6, %c0_7, %c0_8] : memref<1x1x128xf32, #tpu.memory_space<vmem>>, vector<1x1x128xf32>
    %11 = vector.shape_cast %10 : vector<1x1x128xf32> to vector<1x128xf32>
    %c0_9 = arith.constant 0 : index
    %c0_10 = arith.constant 0 : index
    %c0_11 = arith.constant 0 : index
    %12 = vector.load %arg7[%c0_9, %c0_10, %c0_11] : memref<1x128x32xbf16, #tpu.memory_space<vmem>>, vector<1x128x32xbf16>
    %13 = vector.shape_cast %12 : vector<1x128x32xbf16> to vector<128x32xbf16>
    %c0_12 = arith.constant 0 : index
    %c0_13 = arith.constant 0 : index
    %14 = vector.load %arg9[%c0_12, %c0_13] : memref<16x32xf32, #tpu.memory_space<vmem>>, vector<16x32xf32>
    %15 = vector.extract_strided_slice %4 {offsets = [0, 0], sizes = [1, 32], strides = [1, 1]} : vector<8x32xf32> to vector<1x32xf32>
    %16 = vector.extract_strided_slice %4 {offsets = [1, 0], sizes = [1, 32], strides = [1, 1]} : vector<8x32xf32> to vector<1x32xf32>
    %c0_14 = arith.constant 0 : index
    %c0_15 = arith.constant 0 : index
    %c0_16 = arith.constant 0 : index
    %c0_17 = arith.constant 0 : index
    %17 = vector.load %arg2[%c0_14, %c0_15, %c0_16, %c0_17] : memref<1x2x8x8xbf16, #tpu.memory_space<vmem>>, vector<1x1x8x8xbf16>
    %18 = vector.shape_cast %17 : vector<1x1x8x8xbf16> to vector<8x8xbf16>
    %c0_18 = arith.constant 0 : index
    %c0_19 = arith.constant 0 : index
    %c0_20 = arith.constant 0 : index
    %c0_21 = arith.constant 0 : index
    %19 = vector.load %arg3[%c0_18, %c0_19, %c0_20, %c0_21] : memref<1x2x8x1xf32, #tpu.memory_space<vmem>>, vector<1x1x8x1xf32>
    %20 = vector.shape_cast %19 : vector<1x1x8x1xf32> to vector<8x1xf32>
    %cst = arith.constant dense<0.000000e+00> : vector<16xf32>
    %21 = vector.multi_reduction <add>, %14, %cst [1] : vector<16x32xf32> to vector<16xf32>
    %22 = vector.shape_cast %21 : vector<16xf32> to vector<16x1xf32>
    %cst_22 = arith.constant 3.200000e+01 : f32
    %23 = vector.broadcast %cst_22 : f32 to vector<16x1xf32>
    %24 = arith.divf %22, %23 : vector<16x1xf32>
    %25 = vector.broadcast %24 : vector<16x1xf32> to vector<16x32xf32>
    %26 = arith.subf %14, %25 : vector<16x32xf32>
    %27 = arith.mulf %26, %26 : vector<16x32xf32>
    %cst_23 = arith.constant dense<0.000000e+00> : vector<16xf32>
    %28 = vector.multi_reduction <add>, %27, %cst_23 [1] : vector<16x32xf32> to vector<16xf32>
    %29 = vector.shape_cast %28 : vector<16xf32> to vector<16x1xf32>
    %cst_24 = arith.constant 3.200000e+01 : f32
    %30 = vector.broadcast %cst_24 : f32 to vector<16x1xf32>
    %31 = arith.divf %29, %30 : vector<16x1xf32>
    %32 = vector.broadcast %24 : vector<16x1xf32> to vector<16x32xf32>
    %33 = arith.subf %14, %32 : vector<16x32xf32>
    %cst_25 = arith.constant 9.99999974E-6 : f32
    %34 = vector.broadcast %cst_25 : f32 to vector<16x1xf32>
    %35 = arith.addf %31, %34 : vector<16x1xf32>
    %36 = math.rsqrt %35 : vector<16x1xf32>
    %37 = vector.broadcast %36 : vector<16x1xf32> to vector<16x32xf32>
    %38 = arith.mulf %33, %37 : vector<16x32xf32>
    %39 = vector.broadcast %15 : vector<1x32xf32> to vector<16x32xf32>
    %40 = arith.mulf %38, %39 : vector<16x32xf32>
    %41 = vector.broadcast %16 : vector<1x32xf32> to vector<16x32xf32>
    %42 = arith.addf %40, %41 : vector<16x32xf32>
    %43 = vector.extract_strided_slice %42 {offsets = [0, 0], sizes = [8, 32], strides = [1, 1]} : vector<16x32xf32> to vector<8x32xf32>
    %44 = arith.truncf %43 : vector<8x32xf32> to vector<8x32xbf16>
    %cst_26 = arith.constant dense<0.000000e+00> : vector<8x32xf32>
    %45 = tpu.matmul %18, %44, %cst_26 {dimension_numbers = #tpu.dot_dimension_numbers<[1], [0], [0], [1], [0, 0, 1, 1], [], []>} : vector<8x8xbf16>, vector<8x32xbf16>, vector<8x32xf32> -> vector<8x32xf32>
    %46 = vector.broadcast %20 : vector<8x1xf32> to vector<8x32xf32>
    %47 = arith.addf %45, %46 : vector<8x32xf32>
    %48 = vector.extract_strided_slice %42 {offsets = [8, 0], sizes = [8, 32], strides = [1, 1]} : vector<16x32xf32> to vector<8x32xf32>
    %49 = arith.truncf %48 : vector<8x32xf32> to vector<8x32xbf16>
    %cst_27 = arith.constant dense<0.000000e+00> : vector<8x32xf32>
    %50 = tpu.matmul %18, %49, %cst_27 {dimension_numbers = #tpu.dot_dimension_numbers<[1], [0], [0], [1], [0, 0, 1, 1], [], []>} : vector<8x8xbf16>, vector<8x32xbf16>, vector<8x32xf32> -> vector<8x32xf32>
    %51 = vector.broadcast %20 : vector<8x1xf32> to vector<8x32xf32>
    %52 = arith.addf %50, %51 : vector<8x32xf32>
    %53 = tpu.concatenate %47, %52 in 0 : vector<8x32xf32>, vector<8x32xf32> -> vector<16x32xf32>
    %54 = arith.addf %53, %14 : vector<16x32xf32>
    %cst_28 = arith.constant dense<0.000000e+00> : vector<16xf32>
    %55 = vector.multi_reduction <add>, %54, %cst_28 [1] : vector<16x32xf32> to vector<16xf32>
    %56 = vector.shape_cast %55 : vector<16xf32> to vector<16x1xf32>
    %cst_29 = arith.constant 3.200000e+01 : f32
    %57 = vector.broadcast %cst_29 : f32 to vector<16x1xf32>
    %58 = arith.divf %56, %57 : vector<16x1xf32>
    %59 = vector.broadcast %58 : vector<16x1xf32> to vector<16x32xf32>
    %60 = arith.subf %54, %59 : vector<16x32xf32>
    %61 = arith.mulf %60, %60 : vector<16x32xf32>
    %cst_30 = arith.constant dense<0.000000e+00> : vector<16xf32>
    %62 = vector.multi_reduction <add>, %61, %cst_30 [1] : vector<16x32xf32> to vector<16xf32>
    %63 = vector.shape_cast %62 : vector<16xf32> to vector<16x1xf32>
    %cst_31 = arith.constant 3.200000e+01 : f32
    %64 = vector.broadcast %cst_31 : f32 to vector<16x1xf32>
    %65 = arith.divf %63, %64 : vector<16x1xf32>
    %66 = vector.broadcast %58 : vector<16x1xf32> to vector<16x32xf32>
    %67 = arith.subf %54, %66 : vector<16x32xf32>
    %cst_32 = arith.constant 9.99999974E-6 : f32
    %68 = vector.broadcast %cst_32 : f32 to vector<16x1xf32>
    %69 = arith.addf %65, %68 : vector<16x1xf32>
    %70 = math.rsqrt %69 : vector<16x1xf32>
    %71 = vector.broadcast %70 : vector<16x1xf32> to vector<16x32xf32>
    %72 = arith.mulf %67, %71 : vector<16x32xf32>
    %73 = vector.broadcast %5 : vector<1x32xf32> to vector<16x32xf32>
    %74 = arith.mulf %72, %73 : vector<16x32xf32>
    %75 = vector.broadcast %6 : vector<1x32xf32> to vector<16x32xf32>
    %76 = arith.addf %74, %75 : vector<16x32xf32>
    %77 = arith.truncf %76 : vector<16x32xf32> to vector<16x32xbf16>
    %cst_33 = arith.constant dense<0.000000e+00> : vector<16x128xf32>
    %78 = tpu.matmul %77, %9, %cst_33 {dimension_numbers = #tpu.dot_dimension_numbers<[1], [0], [0], [1], [0, 0, 1, 1], [], []>} : vector<16x32xbf16>, vector<32x128xbf16>, vector<16x128xf32> -> vector<16x128xf32>
    %79 = vector.broadcast %11 : vector<1x128xf32> to vector<16x128xf32>
    %80 = arith.addf %78, %79 : vector<16x128xf32>
    %cst_34 = arith.constant 5.000000e-01 : f32
    %81 = vector.broadcast %cst_34 : f32 to vector<16x128xf32>
    %82 = arith.mulf %81, %80 : vector<16x128xf32>
    %cst_35 = arith.constant 4.471500e-02 : f32
    %83 = vector.broadcast %cst_35 : f32 to vector<16x128xf32>
    %84 = arith.mulf %83, %80 : vector<16x128xf32>
    %85 = arith.mulf %84, %80 : vector<16x128xf32>
    %86 = arith.mulf %85, %80 : vector<16x128xf32>
    %87 = arith.addf %80, %86 : vector<16x128xf32>
    %cst_36 = arith.constant 0.797884583 : f32
    %88 = vector.broadcast %cst_36 : f32 to vector<16x128xf32>
    %89 = arith.mulf %88, %87 : vector<16x128xf32>
    %90 = math.tanh %89 : vector<16x128xf32>
    %cst_37 = arith.constant 1.000000e+00 : f32
    %91 = vector.broadcast %cst_37 : f32 to vector<16x128xf32>
    %92 = arith.addf %91, %90 : vector<16x128xf32>
    %93 = arith.mulf %82, %92 : vector<16x128xf32>
    %94 = arith.truncf %93 : vector<16x128xf32> to vector<16x128xbf16>
    %cst_38 = arith.constant dense<0.000000e+00> : vector<16x32xf32>
    %95 = tpu.matmul %94, %13, %cst_38 {dimension_numbers = #tpu.dot_dimension_numbers<[1], [0], [0], [1], [0, 0, 1, 1], [], []>} : vector<16x128xbf16>, vector<128x32xbf16>, vector<16x32xf32> -> vector<16x32xf32>
    %96 = vector.broadcast %7 : vector<1x32xf32> to vector<16x32xf32>
    %97 = arith.addf %95, %96 : vector<16x32xf32>
    %98 = arith.addf %97, %54 : vector<16x32xf32>
    %c0_39 = arith.constant 0 : index
    %c0_40 = arith.constant 0 : index
    %99 = vector.load %arg10[%c0_39, %c0_40] : memref<16x32xf32, #tpu.memory_space<vmem>>, vector<16x32xf32>
    %100 = vector.extract_strided_slice %4 {offsets = [2, 0], sizes = [1, 32], strides = [1, 1]} : vector<8x32xf32> to vector<1x32xf32>
    %101 = vector.extract_strided_slice %4 {offsets = [3, 0], sizes = [1, 32], strides = [1, 1]} : vector<8x32xf32> to vector<1x32xf32>
    %c0_41 = arith.constant 0 : index
    %c1 = arith.constant 1 : index
    %c0_42 = arith.constant 0 : index
    %c0_43 = arith.constant 0 : index
    %102 = vector.load %arg2[%c0_41, %c1, %c0_42, %c0_43] : memref<1x2x8x8xbf16, #tpu.memory_space<vmem>>, vector<1x1x8x8xbf16>
    %103 = vector.shape_cast %102 : vector<1x1x8x8xbf16> to vector<8x8xbf16>
    %c0_44 = arith.constant 0 : index
    %c1_45 = arith.constant 1 : index
    %c0_46 = arith.constant 0 : index
    %c0_47 = arith.constant 0 : index
    %104 = vector.load %arg3[%c0_44, %c1_45, %c0_46, %c0_47] : memref<1x2x8x1xf32, #tpu.memory_space<vmem>>, vector<1x1x8x1xf32>
    %105 = vector.shape_cast %104 : vector<1x1x8x1xf32> to vector<8x1xf32>
    %cst_48 = arith.constant dense<0.000000e+00> : vector<16xf32>
    %106 = vector.multi_reduction <add>, %99, %cst_48 [1] : vector<16x32xf32> to vector<16xf32>
    %107 = vector.shape_cast %106 : vector<16xf32> to vector<16x1xf32>
    %cst_49 = arith.constant 3.200000e+01 : f32
    %108 = vector.broadcast %cst_49 : f32 to vector<16x1xf32>
    %109 = arith.divf %107, %108 : vector<16x1xf32>
    %110 = vector.broadcast %109 : vector<16x1xf32> to vector<16x32xf32>
    %111 = arith.subf %99, %110 : vector<16x32xf32>
    %112 = arith.mulf %111, %111 : vector<16x32xf32>
    %cst_50 = arith.constant dense<0.000000e+00> : vector<16xf32>
    %113 = vector.multi_reduction <add>, %112, %cst_50 [1] : vector<16x32xf32> to vector<16xf32>
    %114 = vector.shape_cast %113 : vector<16xf32> to vector<16x1xf32>
    %cst_51 = arith.constant 3.200000e+01 : f32
    %115 = vector.broadcast %cst_51 : f32 to vector<16x1xf32>
    %116 = arith.divf %114, %115 : vector<16x1xf32>
    %117 = vector.broadcast %109 : vector<16x1xf32> to vector<16x32xf32>
    %118 = arith.subf %99, %117 : vector<16x32xf32>
    %cst_52 = arith.constant 9.99999974E-6 : f32
    %119 = vector.broadcast %cst_52 : f32 to vector<16x1xf32>
    %120 = arith.addf %116, %119 : vector<16x1xf32>
    %121 = math.rsqrt %120 : vector<16x1xf32>
    %122 = vector.broadcast %121 : vector<16x1xf32> to vector<16x32xf32>
    %123 = arith.mulf %118, %122 : vector<16x32xf32>
    %124 = vector.broadcast %100 : vector<1x32xf32> to vector<16x32xf32>
    %125 = arith.mulf %123, %124 : vector<16x32xf32>
    %126 = vector.broadcast %101 : vector<1x32xf32> to vector<16x32xf32>
    %127 = arith.addf %125, %126 : vector<16x32xf32>
    %128 = vector.extract_strided_slice %127 {offsets = [0, 0], sizes = [8, 32], strides = [1, 1]} : vector<16x32xf32> to vector<8x32xf32>
    %129 = arith.truncf %128 : vector<8x32xf32> to vector<8x32xbf16>
    %cst_53 = arith.constant dense<0.000000e+00> : vector<8x32xf32>
    %130 = tpu.matmul %103, %129, %cst_53 {dimension_numbers = #tpu.dot_dimension_numbers<[1], [0], [0], [1], [0, 0, 1, 1], [], []>} : vector<8x8xbf16>, vector<8x32xbf16>, vector<8x32xf32> -> vector<8x32xf32>
    %131 = vector.broadcast %105 : vector<8x1xf32> to vector<8x32xf32>
    %132 = arith.addf %130, %131 : vector<8x32xf32>
    %133 = vector.extract_strided_slice %127 {offsets = [8, 0], sizes = [8, 32], strides = [1, 1]} : vector<16x32xf32> to vector<8x32xf32>
    %134 = arith.truncf %133 : vector<8x32xf32> to vector<8x32xbf16>
    %cst_54 = arith.constant dense<0.000000e+00> : vector<8x32xf32>
    %135 = tpu.matmul %103, %134, %cst_54 {dimension_numbers = #tpu.dot_dimension_numbers<[1], [0], [0], [1], [0, 0, 1, 1], [], []>} : vector<8x8xbf16>, vector<8x32xbf16>, vector<8x32xf32> -> vector<8x32xf32>
    %136 = vector.broadcast %105 : vector<8x1xf32> to vector<8x32xf32>
    %137 = arith.addf %135, %136 : vector<8x32xf32>
    %138 = tpu.concatenate %132, %137 in 0 : vector<8x32xf32>, vector<8x32xf32> -> vector<16x32xf32>
    %139 = arith.addf %138, %99 : vector<16x32xf32>
    %cst_55 = arith.constant dense<0.000000e+00> : vector<16xf32>
    %140 = vector.multi_reduction <add>, %139, %cst_55 [1] : vector<16x32xf32> to vector<16xf32>
    %141 = vector.shape_cast %140 : vector<16xf32> to vector<16x1xf32>
    %cst_56 = arith.constant 3.200000e+01 : f32
    %142 = vector.broadcast %cst_56 : f32 to vector<16x1xf32>
    %143 = arith.divf %141, %142 : vector<16x1xf32>
    %144 = vector.broadcast %143 : vector<16x1xf32> to vector<16x32xf32>
    %145 = arith.subf %139, %144 : vector<16x32xf32>
    %146 = arith.mulf %145, %145 : vector<16x32xf32>
    %cst_57 = arith.constant dense<0.000000e+00> : vector<16xf32>
    %147 = vector.multi_reduction <add>, %146, %cst_57 [1] : vector<16x32xf32> to vector<16xf32>
    %148 = vector.shape_cast %147 : vector<16xf32> to vector<16x1xf32>
    %cst_58 = arith.constant 3.200000e+01 : f32
    %149 = vector.broadcast %cst_58 : f32 to vector<16x1xf32>
    %150 = arith.divf %148, %149 : vector<16x1xf32>
    %151 = vector.broadcast %143 : vector<16x1xf32> to vector<16x32xf32>
    %152 = arith.subf %139, %151 : vector<16x32xf32>
    %cst_59 = arith.constant 9.99999974E-6 : f32
    %153 = vector.broadcast %cst_59 : f32 to vector<16x1xf32>
    %154 = arith.addf %150, %153 : vector<16x1xf32>
    %155 = math.rsqrt %154 : vector<16x1xf32>
    %156 = vector.broadcast %155 : vector<16x1xf32> to vector<16x32xf32>
    %157 = arith.mulf %152, %156 : vector<16x32xf32>
    %158 = vector.broadcast %5 : vector<1x32xf32> to vector<16x32xf32>
    %159 = arith.mulf %157, %158 : vector<16x32xf32>
    %160 = vector.broadcast %6 : vector<1x32xf32> to vector<16x32xf32>
    %161 = arith.addf %159, %160 : vector<16x32xf32>
    %162 = arith.truncf %161 : vector<16x32xf32> to vector<16x32xbf16>
    %cst_60 = arith.constant dense<0.000000e+00> : vector<16x128xf32>
    %163 = tpu.matmul %162, %9, %cst_60 {dimension_numbers = #tpu.dot_dimension_numbers<[1], [0], [0], [1], [0, 0, 1, 1], [], []>} : vector<16x32xbf16>, vector<32x128xbf16>, vector<16x128xf32> -> vector<16x128xf32>
    %164 = vector.broadcast %11 : vector<1x128xf32> to vector<16x128xf32>
    %165 = arith.addf %163, %164 : vector<16x128xf32>
    %cst_61 = arith.constant 5.000000e-01 : f32
    %166 = vector.broadcast %cst_61 : f32 to vector<16x128xf32>
    %167 = arith.mulf %166, %165 : vector<16x128xf32>
    %cst_62 = arith.constant 4.471500e-02 : f32
    %168 = vector.broadcast %cst_62 : f32 to vector<16x128xf32>
    %169 = arith.mulf %168, %165 : vector<16x128xf32>
    %170 = arith.mulf %169, %165 : vector<16x128xf32>
    %171 = arith.mulf %170, %165 : vector<16x128xf32>
    %172 = arith.addf %165, %171 : vector<16x128xf32>
    %cst_63 = arith.constant 0.797884583 : f32
    %173 = vector.broadcast %cst_63 : f32 to vector<16x128xf32>
    %174 = arith.mulf %173, %172 : vector<16x128xf32>
    %175 = math.tanh %174 : vector<16x128xf32>
    %cst_64 = arith.constant 1.000000e+00 : f32
    %176 = vector.broadcast %cst_64 : f32 to vector<16x128xf32>
    %177 = arith.addf %176, %175 : vector<16x128xf32>
    %178 = arith.mulf %167, %177 : vector<16x128xf32>
    %179 = arith.truncf %178 : vector<16x128xf32> to vector<16x128xbf16>
    %cst_65 = arith.constant dense<0.000000e+00> : vector<16x32xf32>
    %180 = tpu.matmul %179, %13, %cst_65 {dimension_numbers = #tpu.dot_dimension_numbers<[1], [0], [0], [1], [0, 0, 1, 1], [], []>} : vector<16x128xbf16>, vector<128x32xbf16>, vector<16x32xf32> -> vector<16x32xf32>
    %181 = vector.broadcast %7 : vector<1x32xf32> to vector<16x32xf32>
    %182 = arith.addf %180, %181 : vector<16x32xf32>
    %183 = arith.addf %182, %139 : vector<16x32xf32>
    %c0_66 = arith.constant 0 : index
    %c0_67 = arith.constant 0 : index
    %184 = vector.load %arg9[%c0_66, %c0_67] : memref<16x32xf32, #tpu.memory_space<vmem>>, vector<16x32xf32>
    tpu.vector_store %arg9[%c0_66, %c0_67], %98 {strides = array<i32>} : memref<16x32xf32, #tpu.memory_space<vmem>>, vector<16x32xf32>,
    %c0_68 = arith.constant 0 : index
    %c0_69 = arith.constant 0 : index
    %185 = vector.load %arg10[%c0_68, %c0_69] : memref<16x32xf32, #tpu.memory_space<vmem>>, vector<16x32xf32>
    tpu.vector_store %arg10[%c0_68, %c0_69], %183 {strides = array<i32>} : memref<16x32xf32, #tpu.memory_space<vmem>>, vector<16x32xf32>,
    %c1_i32 = arith.constant 1 : i32
    %186 = arith.cmpi eq, %arg0, %c1_i32 : i32
    %187 = arith.extui %186 : i1 to i32
    %c0_i32_70 = arith.constant 0 : i32
    %188 = arith.cmpi ne, %187, %c0_i32_70 : i32
    scf.if %188 {
      %c0_71 = arith.constant 0 : index
      %c0_72 = arith.constant 0 : index
      %189 = vector.load %arg9[%c0_71, %c0_72] : memref<16x32xf32, #tpu.memory_space<vmem>>, vector<16x32xf32>
      %c0_73 = arith.constant 0 : index
      %c0_74 = arith.constant 0 : index
      %190 = vector.load %arg10[%c0_73, %c0_74] : memref<16x32xf32, #tpu.memory_space<vmem>>, vector<16x32xf32>
      %191 = arith.addf %189, %190 : vector<16x32xf32>
      %c0_75 = arith.constant 0 : index
      %c0_76 = arith.constant 0 : index
      %192 = vector.load %arg8[%c0_75, %c0_76] : memref<16x32xf32, #tpu.memory_space<vmem>>, vector<16x32xf32>
      tpu.vector_store %arg8[%c0_75, %c0_76], %191 {strides = array<i32>} : memref<16x32xf32, #tpu.memory_space<vmem>>, vector<16x32xf32>,
    } else {
    }
    return
  }
  func.func @transform_0(%arg0: i32) -> (i32, i32) {
    %c0_i32 = arith.constant 0 : i32
    %c0_i32_0 = arith.constant 0 : i32
    %c0_i32_1 = arith.constant 0 : i32
    return %c0_i32, %c0_i32_0 : i32, i32
  }
  func.func @transform_1(%arg0: i32) -> (i32, i32, i32, i32) {
    %c0_i32 = arith.constant 0 : i32
    %c0_i32_0 = arith.constant 0 : i32
    %c0_i32_1 = arith.constant 0 : i32
    %c0_i32_2 = arith.constant 0 : i32
    return %arg0, %c0_i32, %c0_i32_0, %c0_i32_1 : i32, i32, i32, i32
  }
  func.func @transform_2(%arg0: i32) -> (i32, i32, i32, i32) {
    %c0_i32 = arith.constant 0 : i32
    %c0_i32_0 = arith.constant 0 : i32
    %c0_i32_1 = arith.constant 0 : i32
    %c0_i32_2 = arith.constant 0 : i32
    return %arg0, %c0_i32, %c0_i32_0, %c0_i32_1 : i32, i32, i32, i32
  }
  func.func @transform_3(%arg0: i32) -> (i32, i32, i32) {
    %c0_i32 = arith.constant 0 : i32
    %c0_i32_0 = arith.constant 0 : i32
    %c0_i32_1 = arith.constant 0 : i32
    return %arg0, %c0_i32, %c0_i32_0 : i32, i32, i32
  }
  func.func @transform_4(%arg0: i32) -> (i32, i32, i32) {
    %c0_i32 = arith.constant 0 : i32
    %c0_i32_0 = arith.constant 0 : i32
    %c0_i32_1 = arith.constant 0 : i32
    return %arg0, %c0_i32, %c0_i32_0 : i32, i32, i32
  }
  func.func @transform_5(%arg0: i32) -> (i32, i32, i32) {
    %c0_i32 = arith.constant 0 : i32
    %c0_i32_0 = arith.constant 0 : i32
    %c0_i32_1 = arith.constant 0 : i32
    return %arg0, %c0_i32, %c0_i32_0 : i32, i32, i32
  }
  func.func @transform_6(%arg0: i32) -> (i32, i32, i32) {
    %c0_i32 = arith.constant 0 : i32
    %c0_i32_0 = arith.constant 0 : i32
    %c0_i32_1 = arith.constant 0 : i32
    return %arg0, %c0_i32, %c0_i32_0 : i32, i32, i32
  }
  func.func @transform_7(%arg0: i32) -> (i32, i32) {
    %c0_i32 = arith.constant 0 : i32
    %c0_i32_0 = arith.constant 0 : i32
    %c0_i32_1 = arith.constant 0 : i32
    return %c0_i32, %c0_i32_0 : i32, i32
  }
}

</mosaic_0001>

<bundles_post_ra>
// kernel: tpu_custom_call.1
= control target key start
LH: loop header
LB: loop body
LE: loop exit
PB: predicated region body
PF: predicated region fallthrough
CT: control target
= control target key end

     0   :  { %12 = vsyncpa [#allocation5], 0  ;;  %s1203_s24 = smov 0   ;;  %s1424_s0 = inlined_call_operand.vmem [shape: f32[16,32], index: 0, kind: input, shape index: {}]   ;;  %s1425_s1 = inlined_call_operand.vmem [shape: bf16[2,2,8,8], index: 1, kind: input, shape index: {}]   ;;  %s1426_s2 = inlined_call_operand.vmem [shape: f32[2,2,8,1], index: 2, kind: input, shape index: {}]   ;;  %s1427_s3 = inlined_call_operand.vmem [shape: f32[2,8,32], index: 3, kind: input, shape index: {}]   ;;  %s1428_s4 = inlined_call_operand.vmem [shape: bf16[2,32,128], index: 4, kind: input, shape index: {}]   ;;  %s1429_s5 = inlined_call_operand.vmem [shape: f32[2,1,128], index: 5, kind: input, shape index: {}]   ;;  %s1430_s6 = inlined_call_operand.vmem [shape: bf16[2,128,32], index: 6, kind: input, shape index: {}]   ;;  %s1431_s7 = inlined_call_operand.hbm [shape: f32[16,32], index: 7, kind: output, shape index: {}]  }
   0x1 LB: > { %s1209_s25 = sadd.s32 4294967295, %s1156_s24   ;;  %p992_p0 = scmp.ge.s32.totalorder %s1156_s24, 1  ;;  %s1156_s24 = sphi %s1203_s24, %s18_s24  }
   0x2   : > { %p280_p1 = scmp.lt.s32.totalorder %s1156_s24, 3 }
   0x4   : > { %p281_p2 = pnand %p992_p0, %p280_p1 }
   0x5   : > { %p329_p3 = scmp.lt.s32.totalorder (!%p281_p2), %s1209_s25, 1  ;;  %p1002_p4 = scmp.ne.s32.totalorder (!%p281_p2), %s1209_s25, 0 }
   0x6   : > { %284 = sbr.rel (%p281_p2) target bundleno = 1057 (0x421), region = 48 }
   0xb   : > { %s1215_s26 = scalar_select %p329_p3, %s1209_s25, 1 }
   0xd   : > { %s1056_s27 = sshll.u32 %s1215_s26, 3  ;;  %s1057_s28 = sshll.u32 %s1215_s26, 4 }
   0xe   : > { %s1222_s8 = scalar_lea.vmem %s1425_s1, %s1056_s27  ;;  %s1227_s11 = scalar_lea.vmem %s1426_s2, %s1057_s28 }
   0xf   : > { %s1232_s14 = scalar_lea.vmem %s1427_s3, %s1056_s27  ;;  %s1237_s17 = scalar_lea.vmem %s1428_s4, %s1057_s28 }
  0x10   : > { %s350_s20 = scalar_lea.vmem %s1429_s5, %s1215_s26  ;;  %s1059_s21 = sshll.u32 %s1215_s26, 6 }
  0x11   : > { %s1247_s29 = scalar_lea.vmem %s1430_s6, %s1059_s21  ;;  %360 = sbr.rel (%p1002_p4) target bundleno = 27 (0x1b), region = 52 }
  0x16   : > { %v361_v0 = vld [vmem:[%s1424_s0] sm:$0xff]  ;;  %vm363_vm0 = vcmask 261120   ;;  %v362_v1 = vld [vmem:[%s1424_s0 + $0x8] sm:$0xff] }
  0x17   : > { %364 = vst.msk [vmem:[#allocation2] sm:$0xff] %vm363_vm0, %v361_v0 }
  0x18   : > { %366 = vst.msk [vmem:[#allocation3] sm:$0xff] %vm363_vm0, %v361_v0 }
  0x19   : > { %365 = vst.msk [vmem:[#allocation2 + $0x8] sm:$0xff] %vm363_vm0, %v362_v1 }
  0x1a   : > { %367 = vst.msk [vmem:[#allocation3 + $0x8] sm:$0xff] %vm363_vm0, %v362_v1 }
  0x1b PF: > { %vm394_vm1 = vcmask 261120   ;;  %v1158_v10 = vmov 32.0   ;;  %v1307_v58 = vld [vmem:[%s1232_s14] sm:$0xff]  ;;  %vm462_vm14 = vcmask 1043456   ;;  %vm458_vm0 = vcmask 64512   ;;  %p1051_p5 = scmp.ne.s32.totalorder %s1209_s25, 1 }
  0x1c   : > { %1092 = vrcp.f32 %v1158_v10  ;;  %v449_v10 = vperm.slane %v1307_v58, 1 }
  0x1e   : > { %v1258_v3 = vld [vmem:[#allocation2] sm:$0xff] }
  0x1f   : > { %v1256_v2 = vld [vmem:[#allocation3] sm:$0xff]  ;;  %v395_v5 = vsel %vm394_vm1, %v1258_v3, 0.0 }
  0x20   : > { %v671_v4 = vsel %vm394_vm1, %v1256_v2, 0.0  ;;  %396 = vadd.xlane.f32.xlu0 %v395_v5  ;;  %v1266_v7 = vld [vmem:[#allocation2 + $0x8] sm:$0xff]  ;;  %v446_v5 = vperm.slane %v1307_v58, 0 }
  0x21   : > { %672 = vadd.xlane.f32.xlu1 %v671_v4  ;;  %v1264_v6 = vld [vmem:[#allocation3 + $0x8] sm:$0xff]  ;;  %v398_v9 = vsel %vm394_vm1, %v1266_v7, 0.0 }
  0x22   : > { %v674_v8 = vsel %vm394_vm1, %v1264_v6, 0.0  ;;  %v1093_v11 = vpop.eup %1092 }
  0x23   : > { %v402_v12 = vmul.f32 32.0, %v1093_v11  ;;  %vm406_vm2 = vweird.f32 %v1093_v11 }
  0x25   : > { %v403_v13 = vsub.f32 1.0, %v402_v12 }
  0x27   : > { %v404_v14 = vmul.f32 %v1093_v11, %v403_v13 }
  0x28   : > { %399 = vadd.xlane.f32.xlu0 %v398_v9 }
  0x29   : > { %675 = vadd.xlane.f32.xlu1 %v674_v8  ;;  %v405_v15 = vadd.f32 %v1093_v11, %v404_v14 }
  0x2b   : > { %v1272_v16 = vsel %vm406_vm2, %v1093_v11, %v405_v15  ;;  %v715_v11 = vperm.slane %v1307_v58, 2  ;;  %v718_v15 = vperm.slane %v1307_v58, 3 }
  0x93   : > { %v397_v18 = vpop.xlane.xlu0 %396 }
  0x94   : > { %v673_v17 = vpop.xlane.xlu1 %672  ;;  %v408_v20 = vmul.f32 %v1272_v16, %v397_v18 }
  0x95   : > { %v677_v19 = vmul.f32 %v673_v17, %v1272_v16 }
  0x96   : > { %v1280_v22 = vsub.f32 %v1258_v3, %v408_v20 }
  0x97   : > { %v1277_v21 = vsub.f32 %v1256_v2, %v677_v19 }
  0x98   : > { %v412_v24 = vmul.f32 %v1280_v22, %v1280_v22 }
  0x99   : > { %v681_v23 = vmul.f32 %v1277_v21, %v1277_v21 }
  0x9a   : > { %v414_v26 = vsel %vm394_vm1, %v412_v24, 0.0 }
  0x9b   : > { %v683_v25 = vsel %vm394_vm1, %v681_v23, 0.0  ;;  %415 = vadd.xlane.f32.xlu2 %v414_v26  ;;  %v400_v28 = vpop.xlane.xlu0 %399 }
  0x9c   : > { %v676_v27 = vpop.xlane.xlu1 %675  ;;  %684 = vadd.xlane.f32.xlu0 %v683_v25  ;;  %v409_v30 = vmul.f32 %v1272_v16, %v400_v28 }
  0x9d   : > { %v678_v29 = vmul.f32 %v676_v27, %v1272_v16 }
  0x9e   : > { %v1294_v32 = vsub.f32 %v1266_v7, %v409_v30 }
  0x9f   : > { %v1291_v31 = vsub.f32 %v1264_v6, %v678_v29 }
  0xa0   : > { %v413_v34 = vmul.f32 %v1294_v32, %v1294_v32 }
  0xa1   : > { %v682_v33 = vmul.f32 %v1291_v31, %v1291_v31 }
  0xa2   : > { %v417_v36 = vsel %vm394_vm1, %v413_v34, 0.0 }
  0xa3   : > { %v686_v35 = vsel %vm394_vm1, %v682_v33, 0.0  ;;  %418 = vadd.xlane.f32.xlu2 %v417_v36 }
  0xa4   : > { %687 = vadd.xlane.f32.xlu1 %v686_v35 }
 0x10e   : > { %v416_v37 = vpop.xlane.xlu2 %415 }
 0x10f   : > { %v685_v38 = vpop.xlane.xlu0 %684  ;;  %v420_v39 = vmul.f32 %v416_v37, %v1272_v16  ;;  %v392_v37 = vld [vmem:[%s1222_s8] sm:$0xf] }
 0x110   : > { %v689_v40 = vmul.f32 %v685_v38, %v1272_v16 }
 0x111   : > { %v422_v41 = vadd.f32 1e-05, %v420_v39 }
 0x112   : > { %v691_v42 = vadd.f32 1e-05, %v689_v40  ;;  %v1046_v40 = vld [vmem:[%s1222_s8 + $0x4] sm:$0xf] }
 0x113   : > { %1094 = vrsqrt.f32 %v422_v41  ;;  %vm430_vm6 = vweird.f32 %v422_v41 }
 0x114   : > { %1096 = vrsqrt.f32 %v691_v42  ;;  %vm699_vm3 = vweird.f32 %v691_v42 }
 0x116   : > { %v419_v44 = vpop.xlane.xlu2 %418 }
 0x117   : > { %v688_v43 = vpop.xlane.xlu1 %687  ;;  %v421_v46 = vmul.f32 %v419_v44, %v1272_v16  ;;  %v393_v44 = vld [vmem:[%s1227_s11] sm:$0xff] }
 0x118   : > { %v690_v45 = vmul.f32 %v688_v43, %v1272_v16  ;;  %v1047_v43 = vld [vmem:[%s1227_s11 + $0x8] sm:$0xff] }
 0x119   : > { %v1095_v47 = vpop.eup %1094  ;;  %v423_v49 = vadd.f32 1e-05, %v421_v46 }
 0x11a   : > { %v692_v48 = vadd.f32 1e-05, %v690_v45  ;;  %v1097_v50 = vpop.eup %1096  ;;  %v425_v51 = vmul.f32 %v1095_v47, %v422_v41  ;;  %vm431_vm5 = vweird.f32 %v1095_v47  ;;  %v1159_v45 = vmov 0  }
 0x11b   : > { %v694_v52 = vmul.f32 %v1097_v50, %v691_v42  ;;  %vm700_vm4 = vweird.f32 %v1097_v50  ;;  %vm432_vm8 = vmor %vm430_vm6, %vm431_vm5  ;;  %vm440_vm12 = vweird.f32 %v423_v49  ;;  %1090 = vset.pattern.permute.xlu0 %v1159_v45  ;;  %1089 = vset.pattern.permute.xlu2 %v1159_v45 }
 0x11c   : > { %1098 = vrsqrt.f32 %v692_v48  ;;  %v426_v53 = vmul.f32 %v1095_v47, %v425_v51  ;;  %vm1309_vm7 = vmor %vm699_vm3, %vm700_vm4  ;;  %vm709_vm9 = vweird.f32 %v692_v48  ;;  %724 = vperm.xlu0 %1090, %v1047_v43   ;;  %455 = vperm.xlu2 %1089, %v393_v44  }
 0x11d   : > { %1100 = vrsqrt.f32 %v423_v49  ;;  %v695_v54 = vmul.f32 %v1097_v50, %v694_v52 }
 0x11e   : > { %v427_v55 = vmul.f32 0.5, %v426_v53 }
 0x11f   : > { %v696_v56 = vmul.f32 0.5, %v695_v54 }
 0x120   : > { %v428_v57 = vsub.f32 1.5, %v427_v55 }
 0x121   : > { %v697_v60 = vsub.f32 1.5, %v696_v56 }
 0x122   : > { %v1099_v59 = vpop.eup %1098  ;;  %v429_v62 = vmul.f32 %v1095_v47, %v428_v57 }
 0x123   : > { %v1101_v61 = vpop.eup %1100  ;;  %v704_v0 = vmul.f32 %v1099_v59, %v692_v48  ;;  %v698_v1 = vmul.f32 %v1097_v50, %v697_v60  ;;  %vm710_vm10 = vweird.f32 %v1099_v59 }
 0x124   : > { %v435_v4 = vmul.f32 %v1101_v61, %v423_v49  ;;  %v433_v9 = vsel %vm432_vm8, %v1095_v47, %v429_v62  ;;  %vm711_vm11 = vmor %vm709_vm9, %vm710_vm10  ;;  %vm441_vm13 = vweird.f32 %v1101_v61 }
 0x125   : > { %v705_v8 = vmul.f32 %v1099_v59, %v704_v0  ;;  %v444_v13 = vmul.f32 %v433_v9, %v1280_v22  ;;  %v702_v14 = vsel %vm1309_vm7, %v1097_v50, %v698_v1  ;;  %vm442_vm15 = vmor %vm440_vm12, %vm441_vm13 }
 0x126   : > { %v436_v12 = vmul.f32 %v1101_v61, %v435_v4  ;;  %v713_v18 = vmul.f32 %v702_v14, %v1277_v21 }
 0x127   : > { %v706_v17 = vmul.f32 0.5, %v705_v8  ;;  %v447_v20 = vmul.f32 %v446_v5, %v444_v13 }
 0x128   : > { %v437_v19 = vmul.f32 0.5, %v436_v12  ;;  %v716_v24 = vmul.f32 %v715_v11, %v713_v18 }
 0x129   : > { %v707_v23 = vsub.f32 1.5, %v706_v17  ;;  %v450_v22 = vadd.f32 %v449_v10, %v447_v20 }
 0x12a   : > { %v438_v25 = vsub.f32 1.5, %v437_v19  ;;  %v719_v27 = vadd.f32 %v718_v15, %v716_v24 }
 0x12b   : > { %v708_v26 = vmul.f32 %v1099_v59, %v707_v23  ;;  %v452_v29 = vpack.c.bf16 %v450_v22, %v450_v22 }
 0x12c   : > { %v439_v28 = vmul.f32 %v1101_v61, %v438_v25  ;;  %v721_v21 = vpack.c.bf16 %v719_v27, %v719_v27 }
 0x12d   : > { %v712_v30 = vsel %vm711_vm11, %v1099_v59, %v708_v26  ;;  %v464_v34 = vsel %vm462_vm14, %v452_v29, 0 }
 0x12e   : > { %v714_v33 = vmul.f32 %v712_v30, %v1291_v31  ;;  %v443_v35 = vsel %vm442_vm15, %v1101_v61, %v439_v28  ;;  %473 = vmatpush.bf16.msra.mxu1 %v464_v34  ;;  %v731_v36 = vsel %vm462_vm14, %v721_v21, 0  ;;  %v1061_v34 = vld [vmem:[%s1237_s17 + $0x8] sm:$0xff] }
 0x12f   : > { %v445_v38 = vmul.f32 %v443_v35, %v1294_v32  ;;  %740 = vmatpush.bf16.msra.mxu0 %v731_v36  ;;  %573 = vmatpush.bf16.msra.mxu2 %v1061_v34  ;;  %v1060_v36 = vld [vmem:[%s1237_s17] sm:$0xff] }
 0x130   : > { %v717_v39 = vmul.f32 %v715_v11, %v714_v33 }
 0x131   : > { %v448_v41 = vmul.f32 %v446_v5, %v445_v38  ;;  %1003 = vmatmul.msk.bf16.vlgmr.msra.gmra.mxu1 %vm458_vm0, %v392_v37 }
 0x132   : > { %v720_v42 = vadd.f32 %v718_v15, %v717_v39  ;;  %1048 = vmatmul.msk.bf16.vlgmr.msra.gmra.mxu0 %vm458_vm0, %v1046_v40 }
 0x133   : > { %v451_v31 = vadd.f32 %v449_v10, %v448_v41  ;;  %574 = vmatpush.bf16.msra.mxu2 %v1060_v36 }
 0x134   : > { %v746_v46 = vpack.c.bf16 %v720_v42, %v720_v42 }
 0x135   : > { %v479_v47 = vpack.c.bf16 %v451_v31, %v451_v31 }
 0x136   : > { %v748_v32 = vsel %vm462_vm14, %v746_v46, 0 }
 0x137   : > { %v481_v48 = vsel %vm462_vm14, %v479_v47, 0  ;;  %823 = vmatpush.bf16.msrb.mxu2 %v1061_v34  ;;  %v1065_v34 = vld [vmem:[%s1247_s29 + $0x18] sm:$0xff] }
 0x138   : > { %490 = vmatpush.bf16.msrb.mxu1 %v481_v48 }
 0x13b   : > { %824 = vmatpush.bf16.msrb.mxu2 %v1060_v36  ;;  %v1063_v36 = vld [vmem:[%s1247_s29 + $0x8] sm:$0xff] }
 0x13c   : > { %757 = vmatpush.bf16.msra.mxu1 %v748_v32 }
 0x141   : > { %1004 = vmatmul.msk.bf16.vlgmr.msrb.gmra.mxu1 %vm458_vm0, %v392_v37 }
 0x151   : > { %1049 = vmatmul.msk.bf16.vlgmr.msra.gmra.mxu1 %vm458_vm0, %v1046_v40 }
 0x176   : > { %v456_v49 = vpop.permute.xlu2 %455 }
 0x18e   : > { %v725_v59 = vpop.permute.xlu0 %724 }
 0x1ae   : > { %v475_v50 = vpop.f32.mrf.mxu1 }
 0x1af   : > { %v476_v51 = vadd.f32 %v475_v50, %v456_v49  ;;  %v742_v52 = vpop.f32.mrf.mxu0 }
 0x1b0   : > { %v743_v62 = vadd.f32 %v742_v52, %v725_v59 }
 0x1b1   : > { %v1336_v53 = vadd.f32 %v476_v51, %v1258_v3 }
 0x1b2   : > { %v1346_v3 = vadd.f32 %v743_v62, %v1256_v2 }
 0x1b3   : > { %v498_v54 = vsel %vm394_vm1, %v1336_v53, 0.0 }
 0x1b4   : > { %499 = vadd.xlane.f32.xlu1 %v498_v54  ;;  %v765_v1 = vsel %vm394_vm1, %v1346_v3, 0.0 }
 0x1b6   : > { %v477_v55 = vpop.f32.mrf.mxu1 }
 0x1b7   : > { %v744_v56 = vpop.f32.mrf.mxu0 }
 0x1be   : > { %v492_v57 = vpop.f32.mrf.mxu1 }
 0x1bf   : > { %v493_v60 = vadd.f32 %v492_v57, %v456_v49 }
 0x1c1   : > { %v1341_v61 = vadd.f32 %v493_v60, %v1266_v7 }
 0x1c3   : > { %v501_v63 = vsel %vm394_vm1, %v1341_v61, 0.0 }
 0x1c4   : > { %502 = vadd.xlane.f32.xlu1 %v501_v63 }
 0x1c6   : > { %v494_v0 = vpop.f32.mrf.mxu1 }
 0x1cc   : > { %766 = vadd.xlane.f32.xlu1 %v765_v1 }
 0x1ce   : > { %v759_v4 = vpop.f32.mrf.mxu1 }
 0x1cf   : > { %v760_v5 = vadd.f32 %v759_v4, %v725_v59  ;;  %v542_v59 = vperm.slane %v1307_v58, 4 }
 0x1d1   : > { %v1351_v8 = vadd.f32 %v760_v5, %v1264_v6  ;;  %v545_v5 = vperm.slane %v1307_v58, 5 }
 0x1d3   : > { %v768_v7 = vsel %vm394_vm1, %v1351_v8, 0.0 }
 0x1d4   : > { %769 = vadd.xlane.f32.xlu2 %v768_v7 }
 0x1d6   : > { %v761_v9 = vpop.f32.mrf.mxu1 }
 0x227   : > { %v500_v10 = vpop.xlane.xlu1 %499 }
 0x228   : > { %v504_v11 = vmul.f32 %v500_v10, %v1272_v16 }
 0x22a   : > { %v506_v2 = vsub.f32 %v1336_v53, %v504_v11 }
 0x22c   : > { %v508_v12 = vmul.f32 %v506_v2, %v506_v2 }
 0x22e   : > { %v510_v13 = vsel %vm394_vm1, %v508_v12, 0.0 }
 0x22f   : > { %511 = vadd.xlane.f32.xlu1 %v510_v13 }
 0x237   : > { %v503_v14 = vpop.xlane.xlu1 %502 }
 0x238   : > { %v505_v15 = vmul.f32 %v503_v14, %v1272_v16 }
 0x23a   : > { %v1360_v6 = vsub.f32 %v1341_v61, %v505_v15 }
 0x23c   : > { %v509_v17 = vmul.f32 %v1360_v6, %v1360_v6 }
 0x23e   : > { %v513_v18 = vsel %vm394_vm1, %v509_v17, 0.0 }
 0x23f   : > { %514 = vadd.xlane.f32.xlu1 %v513_v18  ;;  %v767_v19 = vpop.xlane.xlu1 %766 }
 0x240   : > { %v771_v20 = vmul.f32 %v767_v19, %v1272_v16 }
 0x242   : > { %v1367_v23 = vsub.f32 %v1346_v3, %v771_v20 }
 0x244   : > { %v775_v24 = vmul.f32 %v1367_v23, %v1367_v23 }
 0x246   : > { %v777_v25 = vsel %vm394_vm1, %v775_v24, 0.0 }
 0x247   : > { %v770_v22 = vpop.xlane.xlu2 %769  ;;  %778 = vadd.xlane.f32.xlu0 %v777_v25 }
 0x248   : > { %v772_v26 = vmul.f32 %v770_v22, %v1272_v16 }
 0x24a   : > { %v1374_v27 = vsub.f32 %v1351_v8, %v772_v26 }
 0x24c   : > { %v776_v28 = vmul.f32 %v1374_v27, %v1374_v27 }
 0x24e   : > { %v780_v29 = vsel %vm394_vm1, %v776_v28, 0.0 }
 0x24f   : > { %781 = vadd.xlane.f32.xlu1 %v780_v29 }
 0x2a2   : > { %v512_v30 = vpop.xlane.xlu1 %511 }
 0x2a3   : > { %v516_v21 = vmul.f32 %v512_v30, %v1272_v16 }
 0x2a5   : > { %v518_v33 = vadd.f32 1e-05, %v516_v21  ;;  %v1069_v21 = vld [vmem:[%s1247_s29 + $0x38] sm:$0xff] }
 0x2a6   : > { %649 = vmatpush.bf16.msra.mxu3 %v1069_v21  ;;  %850 = vmatpush.bf16.msrb.mxu0 %v1069_v21 }
 0x2a7   : > { %1102 = vrsqrt.f32 %v518_v33  ;;  %vm526_vm3 = vweird.f32 %v518_v33 }
 0x2ad   : > { %v1103_v35 = vpop.eup %1102 }
 0x2ae   : > { %v521_v37 = vmul.f32 %v1103_v35, %v518_v33  ;;  %vm527_vm2 = vweird.f32 %v1103_v35  ;;  %v1067_v33 = vld [vmem:[%s1247_s29 + $0x28] sm:$0xff] }
 0x2af   : > { %vm528_vm4 = vmor %vm526_vm3, %vm527_vm2 }
 0x2b0   : > { %v522_v38 = vmul.f32 %v1103_v35, %v521_v37  ;;  %v1091_v37 = vld [vmem:[%s350_s20] ss:$0 sm:$0xff] }
 0x2b2   : > { %v515_v39 = vpop.xlane.xlu1 %514  ;;  %v523_v42 = vmul.f32 0.5, %v522_v38  ;;  %v1062_v38 = vld [vmem:[%s1247_s29] sm:$0xff] }
 0x2b3   : > { %v517_v40 = vmul.f32 %v515_v39, %v1272_v16 }
 0x2b4   : > { %v524_v43 = vsub.f32 1.5, %v523_v42 }
 0x2b5   : > { %v519_v41 = vadd.f32 1e-05, %v517_v40 }
 0x2b6   : > { %v525_v47 = vmul.f32 %v1103_v35, %v524_v43 }
 0x2b7   : > { %1104 = vrsqrt.f32 %v519_v41  ;;  %vm536_vm6 = vweird.f32 %v519_v41 }
 0x2b8   : > { %v529_v49 = vsel %vm528_vm4, %v1103_v35, %v525_v47  ;;  %v1064_v35 = vld [vmem:[%s1247_s29 + $0x10] sm:$0xff] }
 0x2b9   : > { %v540_v56 = vmul.f32 %v529_v49, %v506_v2 }
 0x2ba   : > { %v779_v44 = vpop.xlane.xlu0 %778 }
 0x2bb   : > { %v783_v31 = vmul.f32 %v779_v44, %v1272_v16  ;;  %v543_v4 = vmul.f32 %v542_v59, %v540_v56 }
 0x2bd   : > { %v1105_v45 = vpop.eup %1104  ;;  %v785_v46 = vadd.f32 1e-05, %v783_v31  ;;  %v546_v11 = vadd.f32 %v545_v5, %v543_v4 }
 0x2be   : > { %v531_v32 = vmul.f32 %v1105_v45, %v519_v41  ;;  %vm537_vm5 = vweird.f32 %v1105_v45 }
 0x2bf   : > { %1106 = vrsqrt.f32 %v785_v46  ;;  %vm538_vm7 = vmor %vm536_vm6, %vm537_vm5  ;;  %vm793_vm9 = vweird.f32 %v785_v46 }
 0x2c0   : > { %v532_v48 = vmul.f32 %v1105_v45, %v531_v32 }
 0x2c2   : > { %v533_v50 = vmul.f32 0.5, %v532_v48  ;;  %v782_v51 = vpop.xlane.xlu1 %781 }
 0x2c3   : > { %v784_v52 = vmul.f32 %v782_v51, %v1272_v16 }
 0x2c4   : > { %v534_v54 = vsub.f32 1.5, %v533_v50 }
 0x2c5   : > { %v1107_v55 = vpop.eup %1106  ;;  %v786_v57 = vadd.f32 1e-05, %v784_v52 }
 0x2c6   : > { %v535_v60 = vmul.f32 %v1105_v45, %v534_v54  ;;  %v788_v62 = vmul.f32 %v1107_v55, %v785_v46  ;;  %vm794_vm8 = vweird.f32 %v1107_v55 }
 0x2c7   : > { %1108 = vrsqrt.f32 %v786_v57  ;;  %vm795_vm10 = vmor %vm793_vm9, %vm794_vm8  ;;  %vm803_vm12 = vweird.f32 %v786_v57 }
 0x2c8   : > { %v539_v63 = vsel %vm538_vm7, %v1105_v45, %v535_v60  ;;  %v789_v0 = vmul.f32 %v1107_v55, %v788_v62 }
 0x2c9   : > { %v541_v1 = vmul.f32 %v539_v63, %v1360_v6 }
 0x2ca   : > { %v790_v16 = vmul.f32 0.5, %v789_v0 }
 0x2cb   : > { %v544_v7 = vmul.f32 %v542_v59, %v541_v1 }
 0x2cc   : > { %v791_v9 = vsub.f32 1.5, %v790_v16 }
 0x2cd   : > { %v1109_v10 = vpop.eup %1108  ;;  %v547_v2 = vadd.f32 %v545_v5, %v544_v7 }
 0x2ce   : > { %v792_v12 = vmul.f32 %v1107_v55, %v791_v9  ;;  %v798_v13 = vmul.f32 %v1109_v10, %v786_v57  ;;  %vm804_vm11 = vweird.f32 %v1109_v10 }
 0x2cf   : > { %v548_v14 = vpack.c.bf16 %v547_v2, %v546_v11  ;;  %vm805_vm13 = vmor %vm803_vm12, %vm804_vm11 }
 0x2d0   : > { %v799_v15 = vmul.f32 %v1109_v10, %v798_v13  ;;  %v796_v17 = vsel %vm795_vm10, %v1107_v55, %v792_v12 }
 0x2d1   : > { %1013 = vmatmul.msk.bf16.vlgmr.msra.gmra.mxu2 %vm394_vm1, %v548_v14  ;;  %v807_v19 = vmul.f32 %v796_v17, %v1367_v23  ;;  %v1068_v23 = vld [vmem:[%s1247_s29 + $0x30] sm:$0xff] }
 0x2d2   : > { %v800_v6 = vmul.f32 0.5, %v799_v15  ;;  %650 = vmatpush.bf16.msra.mxu3 %v1068_v23  ;;  %851 = vmatpush.bf16.msrb.mxu0 %v1068_v23 }
 0x2d3   : > { %v809_v22 = vmul.f32 %v807_v19, %v542_v59 }
 0x2d4   : > { %v801_v18 = vsub.f32 1.5, %v800_v6 }
 0x2d5   : > { %v811_v28 = vadd.f32 %v809_v22, %v545_v5 }
 0x2d6   : > { %v802_v20 = vmul.f32 %v1109_v10, %v801_v18  ;;  %651 = vmatpush.bf16.msra.mxu3 %v1067_v33  ;;  %852 = vmatpush.bf16.msrb.mxu0 %v1067_v33 }
 0x2d8   : > { %v806_v24 = vsel %vm805_vm13, %v1109_v10, %v802_v20 }
 0x2d9   : > { %v808_v25 = vmul.f32 %v806_v24, %v1374_v27  ;;  %v1066_v27 = vld [vmem:[%s1247_s29 + $0x20] sm:$0xff] }
 0x2da   : > { %652 = vmatpush.bf16.msra.mxu3 %v1066_v27  ;;  %853 = vmatpush.bf16.msrb.mxu0 %v1066_v27 }
 0x2db   : > { %v810_v26 = vmul.f32 %v808_v25, %v542_v59 }
 0x2dd   : > { %v812_v29 = vadd.f32 %v810_v26, %v545_v5  ;;  %v600_v26 = vperm.slane %v1307_v58, 6 }
 0x2de   : > { %653 = vmatpush.bf16.msra.mxu3 %v1065_v34  ;;  %854 = vmatpush.bf16.msrb.mxu0 %v1065_v34 }
 0x2df   : > { %v813_v30 = vpack.c.bf16 %v812_v29, %v811_v28 }
 0x2e1   : > { %1050 = vmatmul.msk.bf16.vlgmr.msrb.gmra.mxu2 %vm394_vm1, %v813_v30 }
 0x2e2   : > { %654 = vmatpush.bf16.msra.mxu3 %v1064_v35  ;;  %855 = vmatpush.bf16.msrb.mxu0 %v1064_v35 }
 0x2e6   : > { %655 = vmatpush.bf16.msra.mxu3 %v1063_v36  ;;  %856 = vmatpush.bf16.msrb.mxu0 %v1063_v36 }
 0x2ea   : > { %656 = vmatpush.bf16.msra.mxu3 %v1062_v38  ;;  %857 = vmatpush.bf16.msrb.mxu0 %v1062_v38 }
 0x354   : > { %v576_v39 = vpop.f32.mrf.mxu2 }
 0x355   : > { %v577_v40 = vadd.f32 %v1091_v37, %v576_v39 }
 0x357   : > { %v583_v41 = vmul.f32 0.044715, %v577_v40  ;;  %v581_v4 = vmul.f32 0.5, %v577_v40 }
 0x359   : > { %v585_v42 = vmul.f32 %v583_v41, %v577_v40 }
 0x35b   : > { %v587_v43 = vmul.f32 %v585_v42, %v577_v40 }
 0x35c   : > { %v578_v44 = vpop.f32.mrf.mxu2 }
 0x35d   : > { %v579_v31 = vadd.f32 %v1091_v37, %v578_v44  ;;  %v589_v45 = vadd.f32 %v587_v43, %v577_v40 }
 0x35f   : > { %v584_v46 = vmul.f32 0.044715, %v579_v31  ;;  %v591_v32 = vmul.f32 0.7978846, %v589_v45  ;;  %v582_v5 = vmul.f32 0.5, %v579_v31 }
 0x361   : > { %v586_v47 = vmul.f32 %v584_v46, %v579_v31  ;;  %1110 = vtanh.f32 %v591_v32 }
 0x363   : > { %v588_v48 = vmul.f32 %v586_v47, %v579_v31 }
 0x364   : > { %v826_v49 = vpop.f32.mrf.mxu2 }
 0x365   : > { %v827_v50 = vadd.f32 %v1091_v37, %v826_v49  ;;  %v590_v51 = vadd.f32 %v588_v48, %v579_v31 }
 0x367   : > { %v833_v52 = vmul.f32 0.044715, %v827_v50  ;;  %v592_v54 = vmul.f32 0.7978846, %v590_v51  ;;  %v1111_v56 = vpop.eup %1110  ;;  %v831_v18 = vmul.f32 0.5, %v827_v50 }
 0x368   : > { %v595_v63 = vadd.f32 1.0, %v1111_v56 }
 0x369   : > { %v835_v55 = vmul.f32 %v833_v52, %v827_v50  ;;  %1112 = vtanh.f32 %v592_v54 }
 0x36a   : > { %v597_v10 = vmul.f32 %v595_v63, %v581_v4 }
 0x36b   : > { %v837_v57 = vmul.f32 %v835_v55, %v827_v50 }
 0x36c   : > { %v828_v59 = vpop.f32.mrf.mxu2 }
 0x36d   : > { %v829_v60 = vadd.f32 %v1091_v37, %v828_v59  ;;  %v839_v62 = vadd.f32 %v837_v57, %v827_v50 }
 0x36f   : > { %v1113_v0 = vpop.eup %1112  ;;  %v834_v1 = vmul.f32 0.044715, %v829_v60  ;;  %v841_v9 = vmul.f32 0.7978846, %v839_v62  ;;  %v832_v19 = vmul.f32 0.5, %v829_v60 }
 0x370   : > { %v596_v16 = vadd.f32 1.0, %v1113_v0 }
 0x371   : > { %v836_v7 = vmul.f32 %v834_v1, %v829_v60  ;;  %1114 = vtanh.f32 %v841_v9 }
 0x372   : > { %v598_v11 = vmul.f32 %v596_v16, %v582_v5 }
 0x373   : > { %v838_v2 = vmul.f32 %v836_v7, %v829_v60 }
 0x374   : > { %v599_v12 = vpack.c.bf16 %v598_v11, %v597_v10 }
 0x375   : > { %v840_v13 = vadd.f32 %v838_v2, %v829_v60 }
 0x376   : > { %657 = vmatmul.bf16.vlgmr.msra.gmra.mxu3 %v599_v12 }
 0x377   : > { %v842_v14 = vmul.f32 0.7978846, %v840_v13  ;;  %v1115_v15 = vpop.eup %1114 }
 0x378   : > { %v845_v17 = vadd.f32 1.0, %v1115_v15 }
 0x379   : > { %1116 = vtanh.f32 %v842_v14 }
 0x37a   : > { %v847_v24 = vmul.f32 %v845_v17, %v831_v18 }
 0x37f   : > { %v1117_v6 = vpop.eup %1116 }
 0x380   : > { %v846_v20 = vadd.f32 1.0, %v1117_v6 }
 0x382   : > { %v848_v25 = vmul.f32 %v846_v20, %v832_v19 }
 0x384   : > { %v849_v22 = vpack.c.bf16 %v848_v25, %v847_v24 }
 0x386   : > { %858 = vmatmul.bf16.vlgmr.msrb.gmra.mxu0 %v849_v22 }
 0x3f9   : > { %v658_v28 = vpop.f32.mrf.mxu3 }
 0x3fa   : > { %v659_v29 = vadd.f32 %v658_v28, %v600_v26 }
 0x3fc   : > { %v663_v30 = vadd.f32 %v659_v29, %v1336_v53 }
 0x3fe   : > { %866 = vst.msk [vmem:[#allocation2] sm:$0xff] %vm394_vm1, %v663_v30 }
 0x401   : > { %v660_v21 = vpop.f32.mrf.mxu3 }
 0x402   : > { %v661_v23 = vadd.f32 %v660_v21, %v600_v26 }
 0x403   : > { %v859_v33 = vpop.f32.mrf.mxu0 }
 0x404   : > { %v664_v27 = vadd.f32 %v661_v23, %v1341_v61  ;;  %v860_v34 = vadd.f32 %v859_v33, %v600_v26 }
 0x406   : > { %867 = vst.msk [vmem:[#allocation2 + $0x8] sm:$0xff] %vm394_vm1, %v664_v27  ;;  %v864_v35 = vadd.f32 %v860_v34, %v1346_v3 }
 0x408   : > { %868 = vst.msk [vmem:[#allocation3] sm:$0xff] %vm394_vm1, %v864_v35 }
 0x40b   : > { %v861_v36 = vpop.f32.mrf.mxu0 }
 0x40c   : > { %v862_v58 = vadd.f32 %v861_v36, %v600_v26  ;;  %873 = sbr.rel (%p1051_p5) target bundleno = 1051 (0x41b), region = 56 }
 0x40e   : > { %v865_v37 = vadd.f32 %v862_v58, %v1351_v8 }
 0x410   : > { %869 = vst.msk [vmem:[#allocation3 + $0x8] sm:$0xff] %vm394_vm1, %v865_v37 }
 0x411   : > { %v874_v53 = vld [vmem:[#allocation2] sm:$0xff]  ;;  %v876_v38 = vld [vmem:[#allocation3] sm:$0xff]  ;;  %v875_v39 = vld [vmem:[#allocation2 + $0x8] sm:$0xff] }
 0x412   : > { %v878_v61 = vadd.f32 %v876_v38, %v874_v53 }
 0x414   : > { %880 = vst.msk [vmem:[#allocation4] sm:$0xff] %vm394_vm1, %v878_v61 }
 0x417   : > { %v877_v40 = vld [vmem:[#allocation3 + $0x8] sm:$0xff] }
 0x418   : > { %v879_v41 = vadd.f32 %v877_v40, %v875_v39 }
 0x41a   : > { %881 = vst.msk [vmem:[#allocation4 + $0x8] sm:$0xff] %vm394_vm1, %v879_v41 }
 0x41b PF: > { %p1074_p6 = scmp.eq.s32.totalorder %s1209_s25, 1  ;;  %s1160_s26 = smov [#allocation4]  }
 0x41c   : > { %s887_s11 = sshll.u32 %s1160_s26, 4  ;;  %s889_s14 = sshll.u32 %s1431_s7, 4  ;;  %s888_s11 = int_to_ptr.vmem [resolvable:$true] %s887_s11  ;;  %s890_s14 = int_to_ptr.hbm [resolvable:$true] %s889_s14 }
 0x41d   : > { %s1161_s15 = smov 128   ;;  %s1162_s16 = smov 8  }
 0x41e   : > { %1071 = dma.vmem_to_hbm [thread:$0]  (%p1074_p6), %s888_s11, 256, %s890_s14, [#allocation5], %s1161_s15, %s1161_s15, %s1162_s16  }
 0x41f   : > { %1151 = dma.done.wait (%p1074_p6), [#allocation5], 256  }
 0x420   : > { %1153 = vsyncadd (%p1074_p6), [#allocation5], 4294967040 }
 0x421 PF: > { %s18_s24 = sadd.s32 1, %s1156_s24  }
 0x422   : > { %p15_p7 = scmp.ge.s32.totalorder %s18_s24, 4  }
 0x424   :  { %17 = sbr.rel (!%p15_p7) target bundleno = 1 (0x1), region = 100 }
 0x429   :  { %906 = vsyncpa [#allocation5], 1 }
 0x42a   :  { %908 = vsyncpa [#allocation5 + $0x1], 1 }

</bundles_post_ra>
